<compile_context>
chip_gen: v7x
topology: tpu7x:2x2x1
jax: 0.10.0
libtpu: 0.0.40
codegen_flags: <defaults>
</compile_context>

<pallas_src>
import jax
import jax.numpy as jnp
from jax.experimental import pallas as pl
from jax.experimental.pallas import tpu as pltpu


_TB = 2048  # batch tile (lane dim). Multiple of 128; intermediates are ~256 KiB f32.


def _softplus(x):
    # Matches torch.nn.Softplus (beta=1, threshold=20): x > 20 -> x, else log1p(exp(x))
    safe = jnp.minimum(x, 20.0)
    return jnp.where(x > 20.0, x, jnp.log1p(jnp.exp(safe)))


def _mlp_kernel(x_ref, w1_ref, b1_ref, w2_ref, b2_ref, w3_ref, b3_ref, o_ref):
    # Activations are [features, batch_tile]: batch is the (fast) lane axis.
    x = x_ref[...]                                   # [2, TB]
    w1 = w1_ref[...]                                 # [32, 2]  (PyTorch [out, in])

    # Layer 1 (2 -> 32): K=2 -> VPU broadcast multiply-adds instead of a near-empty
    # MXU pass.  Bias is a [32,1] lane-broadcast.
    h1 = (w1[:, 0:1] * x[0:1, :]
          + w1[:, 1:2] * x[1:2, :]
          + b1_ref[...])                             # [32, TB]
    h1 = _softplus(h1)

    # Layer 2 (32 -> 32): the only layer worth a full MXU push.
    h2 = jnp.dot(w2_ref[...], h1,
                 preferred_element_type=jnp.float32) + b2_ref[...]   # [32, TB]
    h2 = _softplus(h2)

    # Layer 3 (32 -> 2): MXU slot is otherwise idle, so run the skinny matmul there
    # instead of two XLU sublane reductions + a concat.
    out = jnp.dot(w3_ref[...], h2,
                  preferred_element_type=jnp.float32) + b3_ref[...]  # [2, TB]
    o_ref[...] = out.astype(o_ref.dtype)


def toy_model_forward(x, params):
    """x: [B, 2] float32; params: PyTorch-layout weights ([out, in]). Returns [B, 2]."""
    w1, b1 = params["w1"], params["b1"]              # [32, 2], [32]
    w2, b2 = params["w2"], params["b2"]              # [32, 32], [32]
    w3, b3 = params["w3"], params["b3"]              # [2, 32],  [2]
    B = x.shape[0]

    # Batch-in-lanes layout: transpose once in the wrapper (tiny [B,2] copy in XLA).
    x_t = x.T                                        # [2, B]
    if B <= _TB:
        tb, bp = B, B        # single tile; block == full array, no (8,128) rule needed
    else:
        tb = _TB
        bp = pl.cdiv(B, tb) * tb
        if bp != B:
            x_t = jnp.pad(x_t, ((0, 0), (0, bp - B)))
    grid = (bp // tb,)

    # Biases become [F, 1] lane-broadcast columns in the transposed layout.
    b1c = b1.reshape(-1, 1)
    b2c = b2.reshape(-1, 1)
    b3c = b3.reshape(-1, 1)

    const = lambda a: pl.BlockSpec(a.shape, lambda i: (0,) * a.ndim)
    n_weight_elems = 32 * 2 + 32 + 32 * 32 + 32 + 2 * 32 + 2
    cost = pl.CostEstimate(
        flops=2 * bp * (2 * 32 + 32 * 32 + 32 * 2),
        transcendentals=2 * bp * 64,                 # exp + log1p over 64 features / row
        bytes_accessed=4 * bp * (2 + 2) + 4 * n_weight_elems,
    )

    out_t = pl.pallas_call(
        _mlp_kernel,
        out_shape=jax.ShapeDtypeStruct((2, bp), jnp.float32),
        grid=grid,
        in_specs=[pl.BlockSpec((2, tb), lambda i: (0, i)),
                  const(w1), const(b1c), const(w2), const(b2c),
                  const(w3), const(b3c)],
        out_specs=pl.BlockSpec((2, tb), lambda i: (0, i)),
        compiler_params=pltpu.CompilerParams(
            dimension_semantics=("parallel",)),      # shard batch tiles across v7x TCs
        cost_estimate=cost,
    )(x_t, w1, b1c, w2, b2c, w3, b3c)
    return out_t[:, :B].T                            # back to [B, 2]


def init_params(key):
    """Deterministic init mirroring nn.Linear default (U[-1/sqrt(fan_in), +]),
    stored in PyTorch-native [out, in] layout."""
    ks = jax.random.split(key, 6)

    def linear(kw, kb, fan_in, fan_out):
        bound = 1.0 / jnp.sqrt(float(fan_in))
        w = jax.random.uniform(kw, (fan_out, fan_in), jnp.float32,
                               minval=-bound, maxval=bound)
        b = jax.random.uniform(kb, (fan_out,), jnp.float32,
                               minval=-bound, maxval=bound)
        return w, b

    w1, b1 = linear(ks[0], ks[1], 2, 32)
    w2, b2 = linear(ks[2], ks[3], 32, 32)
    w3, b3 = linear(ks[4], ks[5], 32, 2)
    return {"w1": w1, "b1": b1, "w2": w2, "b2": b2, "w3": w3, "b3": b3}


def _reference(x, p):
    def sp(v):
        return jnp.where(v > 20.0, v, jnp.log1p(jnp.exp(jnp.minimum(v, 20.0))))
    h = sp(x @ p["w1"].T + p["b1"])
    h = sp(h @ p["w2"].T + p["b2"])
    return h @ p["w3"].T + p["b3"]


if __name__ == "__main__":
    key = jax.random.PRNGKey(0)
    kx, kx2, kp = jax.random.split(key, 3)
    params = init_params(kp)

    # Small batch: single-tile path (block == full array).
    B = 8
    x = jax.random.normal(kx, (B, 2), dtype=jnp.float32)
    out = jax.block_until_ready(toy_model_forward(x, params))
    ref = _reference(x, params)
    assert out.shape == (B, 2)
    assert jnp.allclose(out, ref, atol=1e-5, rtol=1e-5)

    # Larger batch: exercises the tiled (grid + padding) path.
    B2 = 2500
    x2 = jax.random.normal(kx2, (B2, 2), dtype=jnp.float32)
    out2 = jax.block_until_ready(toy_model_forward(x2, params))
    ref2 = _reference(x2, params)
    assert out2.shape == (B2, 2)
    assert jnp.allclose(out2, ref2, atol=1e-5, rtol=1e-5)

    print("KERNEL_OK")
</pallas_src>

<mosaic_0001>
module attributes {stable_mosaic.version = 11 : i64} {
  func.func @_mlp_kernel(%arg0: i32, %arg1: memref<2x8xf32, #tpu.memory_space<vmem>>, %arg2: memref<32x2xf32, #tpu.memory_space<vmem>>, %arg3: memref<32x1xf32, #tpu.memory_space<vmem>>, %arg4: memref<32x32xf32, #tpu.memory_space<vmem>>, %arg5: memref<32x1xf32, #tpu.memory_space<vmem>>, %arg6: memref<2x32xf32, #tpu.memory_space<vmem>>, %arg7: memref<2x1xf32, #tpu.memory_space<vmem>>, %arg8: memref<2x8xf32, #tpu.memory_space<vmem>>) attributes {dimension_semantics = [#tpu.dimension_semantics<parallel>], iteration_bounds = array<i64: 1>, scalar_prefetch = 0 : i64, scratch_operands = 0 : i64, tpu.core_type = #tpu.core_type<tc>, window_params = [{transform_indices = @transform_0, window_bounds = array<i64: 2, 8>}, {pipeline_mode = #tpu.pipeline_mode<synchronous>, transform_indices = @transform_1, window_bounds = array<i64: 32, 2>}, {pipeline_mode = #tpu.pipeline_mode<synchronous>, transform_indices = @transform_2, window_bounds = array<i64: 32, 1>}, {pipeline_mode = #tpu.pipeline_mode<synchronous>, transform_indices = @transform_3, window_bounds = array<i64: 32, 32>}, {pipeline_mode = #tpu.pipeline_mode<synchronous>, transform_indices = @transform_4, window_bounds = array<i64: 32, 1>}, {pipeline_mode = #tpu.pipeline_mode<synchronous>, transform_indices = @transform_5, window_bounds = array<i64: 2, 32>}, {pipeline_mode = #tpu.pipeline_mode<synchronous>, transform_indices = @transform_6, window_bounds = array<i64: 2, 1>}, {transform_indices = @transform_7, window_bounds = array<i64: 2, 8>}]} {
    %c0 = arith.constant 0 : index
    %c0_0 = arith.constant 0 : index
    %0 = vector.load %arg1[%c0, %c0_0] : memref<2x8xf32, #tpu.memory_space<vmem>>, vector<2x8xf32>
    %c0_1 = arith.constant 0 : index
    %c0_2 = arith.constant 0 : index
    %1 = vector.load %arg2[%c0_1, %c0_2] : memref<32x2xf32, #tpu.memory_space<vmem>>, vector<32x2xf32>
    %2 = vector.extract_strided_slice %1 {offsets = [0, 0], sizes = [32, 1], strides = [1, 1]} : vector<32x2xf32> to vector<32x1xf32>
    %3 = vector.extract_strided_slice %0 {offsets = [0, 0], sizes = [1, 8], strides = [1, 1]} : vector<2x8xf32> to vector<1x8xf32>
    %4 = vector.broadcast %2 : vector<32x1xf32> to vector<32x8xf32>
    %5 = vector.broadcast %3 : vector<1x8xf32> to vector<32x8xf32>
    %6 = arith.mulf %4, %5 : vector<32x8xf32>
    %7 = vector.extract_strided_slice %1 {offsets = [0, 1], sizes = [32, 1], strides = [1, 1]} : vector<32x2xf32> to vector<32x1xf32>
    %8 = vector.extract_strided_slice %0 {offsets = [1, 0], sizes = [1, 8], strides = [1, 1]} : vector<2x8xf32> to vector<1x8xf32>
    %9 = vector.broadcast %7 : vector<32x1xf32> to vector<32x8xf32>
    %10 = vector.broadcast %8 : vector<1x8xf32> to vector<32x8xf32>
    %11 = arith.mulf %9, %10 : vector<32x8xf32>
    %12 = arith.addf %6, %11 : vector<32x8xf32>
    %c0_3 = arith.constant 0 : index
    %c0_4 = arith.constant 0 : index
    %13 = vector.load %arg3[%c0_3, %c0_4] : memref<32x1xf32, #tpu.memory_space<vmem>>, vector<32x1xf32>
    %14 = vector.broadcast %13 : vector<32x1xf32> to vector<32x8xf32>
    %15 = arith.addf %12, %14 : vector<32x8xf32>
    %cst = arith.constant 2.000000e+01 : f32
    %16 = vector.broadcast %cst : f32 to vector<32x8xf32>
    %17 = arith.minimumf %15, %16 : vector<32x8xf32>
    %cst_5 = arith.constant 2.000000e+01 : f32
    %18 = vector.broadcast %cst_5 : f32 to vector<32x8xf32>
    %19 = arith.cmpf ogt, %15, %18 : vector<32x8xf32>
    %20 = math.exp %17 : vector<32x8xf32>
    %21 = math.log1p %20 : vector<32x8xf32>
    %22 = arith.select %19, %15, %21 : vector<32x8xi1>, vector<32x8xf32>
    %c0_6 = arith.constant 0 : index
    %c0_7 = arith.constant 0 : index
    %23 = vector.load %arg4[%c0_6, %c0_7] : memref<32x32xf32, #tpu.memory_space<vmem>>, vector<32x32xf32>
    %cst_8 = arith.constant dense<0.000000e+00> : vector<32x8xf32>
    %24 = tpu.matmul %23, %22, %cst_8 {dimension_numbers = #tpu.dot_dimension_numbers<[1], [0], [0], [1], [0, 0, 1, 1], [], []>} : vector<32x32xf32>, vector<32x8xf32>, vector<32x8xf32> -> vector<32x8xf32>
    %c0_9 = arith.constant 0 : index
    %c0_10 = arith.constant 0 : index
    %25 = vector.load %arg5[%c0_9, %c0_10] : memref<32x1xf32, #tpu.memory_space<vmem>>, vector<32x1xf32>
    %26 = vector.broadcast %25 : vector<32x1xf32> to vector<32x8xf32>
    %27 = arith.addf %24, %26 : vector<32x8xf32>
    %cst_11 = arith.constant 2.000000e+01 : f32
    %28 = vector.broadcast %cst_11 : f32 to vector<32x8xf32>
    %29 = arith.minimumf %27, %28 : vector<32x8xf32>
    %cst_12 = arith.constant 2.000000e+01 : f32
    %30 = vector.broadcast %cst_12 : f32 to vector<32x8xf32>
    %31 = arith.cmpf ogt, %27, %30 : vector<32x8xf32>
    %32 = math.exp %29 : vector<32x8xf32>
    %33 = math.log1p %32 : vector<32x8xf32>
    %34 = arith.select %31, %27, %33 : vector<32x8xi1>, vector<32x8xf32>
    %c0_13 = arith.constant 0 : index
    %c0_14 = arith.constant 0 : index
    %35 = vector.load %arg6[%c0_13, %c0_14] : memref<2x32xf32, #tpu.memory_space<vmem>>, vector<2x32xf32>
    %cst_15 = arith.constant dense<0.000000e+00> : vector<2x8xf32>
    %36 = tpu.matmul %35, %34, %cst_15 {dimension_numbers = #tpu.dot_dimension_numbers<[1], [0], [0], [1], [0, 0, 1, 1], [], []>} : vector<2x32xf32>, vector<32x8xf32>, vector<2x8xf32> -> vector<2x8xf32>
    %c0_16 = arith.constant 0 : index
    %c0_17 = arith.constant 0 : index
    %37 = vector.load %arg7[%c0_16, %c0_17] : memref<2x1xf32, #tpu.memory_space<vmem>>, vector<2x1xf32>
    %38 = vector.broadcast %37 : vector<2x1xf32> to vector<2x8xf32>
    %39 = arith.addf %36, %38 : vector<2x8xf32>
    %c0_18 = arith.constant 0 : index
    %c0_19 = arith.constant 0 : index
    %40 = vector.load %arg8[%c0_18, %c0_19] : memref<2x8xf32, #tpu.memory_space<vmem>>, vector<2x8xf32>
    tpu.vector_store %arg8[%c0_18, %c0_19], %39 {strides = array<i32>} : memref<2x8xf32, #tpu.memory_space<vmem>>, vector<2x8xf32>,
    return
  }
  func.func @transform_0(%arg0: i32) -> (i32, i32) {
    %c0_i32 = arith.constant 0 : i32
    %c0_i32_0 = arith.constant 0 : i32
    return %c0_i32, %arg0 : i32, i32
  }
  func.func @transform_1(%arg0: i32) -> (i32, i32) {
    %c0_i32 = arith.constant 0 : i32
    %c0_i32_0 = arith.constant 0 : i32
    %c0_i32_1 = arith.constant 0 : i32
    return %c0_i32, %c0_i32_0 : i32, i32
  }
  func.func @transform_2(%arg0: i32) -> (i32, i32) {
    %c0_i32 = arith.constant 0 : i32
    %c0_i32_0 = arith.constant 0 : i32
    %c0_i32_1 = arith.constant 0 : i32
    return %c0_i32, %c0_i32_0 : i32, i32
  }
  func.func @transform_3(%arg0: i32) -> (i32, i32) {
    %c0_i32 = arith.constant 0 : i32
    %c0_i32_0 = arith.constant 0 : i32
    %c0_i32_1 = arith.constant 0 : i32
    return %c0_i32, %c0_i32_0 : i32, i32
  }
  func.func @transform_4(%arg0: i32) -> (i32, i32) {
    %c0_i32 = arith.constant 0 : i32
    %c0_i32_0 = arith.constant 0 : i32
    %c0_i32_1 = arith.constant 0 : i32
    return %c0_i32, %c0_i32_0 : i32, i32
  }
  func.func @transform_5(%arg0: i32) -> (i32, i32) {
    %c0_i32 = arith.constant 0 : i32
    %c0_i32_0 = arith.constant 0 : i32
    %c0_i32_1 = arith.constant 0 : i32
    return %c0_i32, %c0_i32_0 : i32, i32
  }
  func.func @transform_6(%arg0: i32) -> (i32, i32) {
    %c0_i32 = arith.constant 0 : i32
    %c0_i32_0 = arith.constant 0 : i32
    %c0_i32_1 = arith.constant 0 : i32
    return %c0_i32, %c0_i32_0 : i32, i32
  }
  func.func @transform_7(%arg0: i32) -> (i32, i32) {
    %c0_i32 = arith.constant 0 : i32
    %c0_i32_0 = arith.constant 0 : i32
    return %c0_i32, %arg0 : i32, i32
  }
}

</mosaic_0001>

<bundles_post_ra>
// kernel: tpu_custom_call.1
= control target key start
LH: loop header
LB: loop body
LE: loop exit
PB: predicated region body
PF: predicated region fallthrough
CT: control target
= control target key end

     0   :  { %v575_v2 = vmov 1   ;;  %s712_s0 = inlined_call_operand.vmem [shape: f32[2,8], index: 0, kind: input, shape index: {}]   ;;  %s713_s1 = inlined_call_operand.vmem [shape: f32[32,2], index: 1, kind: input, shape index: {}]   ;;  %s714_s2 = inlined_call_operand.vmem [shape: f32[32,1], index: 2, kind: input, shape index: {}]   ;;  %s715_s3 = inlined_call_operand.vmem [shape: f32[32,32], index: 3, kind: input, shape index: {}]   ;;  %s716_s4 = inlined_call_operand.vmem [shape: f32[32,1], index: 4, kind: input, shape index: {}]   ;;  %s717_s5 = inlined_call_operand.vmem [shape: f32[2,32], index: 5, kind: input, shape index: {}]   ;;  %s718_s6 = inlined_call_operand.vmem [shape: f32[2,1], index: 6, kind: input, shape index: {}]   ;;  %s719_s7 = inlined_call_operand.hbm [shape: f32[2,8], index: 7, kind: output, shape index: {}]  }
   0x1   :  { %v30_v0 = vld [vmem:[%s713_s1 + $0x10] sm:$0xff]  ;;  %v28_v1 = vld [vmem:[%s713_s1] sm:$0xff]  ;;  %515 = vset.pattern.permute.xlu0 %v575_v2  ;;  %513 = vset.pattern.permute.xlu1 %v575_v2  ;;  %v29_v3 = vld [vmem:[%s713_s1 + $0x8] sm:$0xff] }
   0x2   :  { %69 = vperm.xlu0 %515, %v30_v0   ;;  %61 = vperm.xlu1 %513, %v28_v1  }
   0x3   :  { %12 = vsyncpa [#allocation3], 0  ;;  %v576_v4 = vmov 0   ;;  %v31_v5 = vld [vmem:[%s713_s1 + $0x18] sm:$0xff]  ;;  %v89_v6 = vld [vmem:[%s714_s2 + $0x8] sm:$0xff]  ;;  %vm200_vm0 = vcmask 261120   ;;  %v52_v16 = vlaneseq }
   0x4   :  { %v88_v7 = vld [vmem:[%s714_s2] sm:$0xff]  ;;  %v90_v9 = vld [vmem:[%s714_s2 + $0x10] sm:$0xff]  ;;  %v91_v11 = vld [vmem:[%s714_s2 + $0x18] sm:$0xff]  ;;  %vm578_vm9 = vmmov 0   ;;  %s580_s10 = smov [#allocation2]  }
   0x5   :  { %v176_v8 = vld [vmem:[%s716_s4] sm:$0xff]  ;;  %v178_v10 = vld [vmem:[%s716_s4 + $0x10] sm:$0xff]  ;;  %v177_v13 = vld [vmem:[%s716_s4 + $0x8] sm:$0xff]  ;;  %v53_v19 = vshrl.u32 %v52_v16, 7  ;;  %s442_s11 = sshll.u32 %s580_s10, 4  ;;  %s443_s11 = int_to_ptr.vmem [resolvable:$true] %s442_s11 }
   0x6   :  { %516 = vset.pattern.permute.xlu0 %v576_v4  ;;  %65 = vperm.xlu1 %513, %v29_v3   ;;  %v355_v12 = vld [vmem:[%s718_s6] sm:$0x3]  ;;  %v179_v14 = vld [vmem:[%s716_s4 + $0x18] sm:$0xff]  ;;  %s551_s12 = scalar_lea.vmem %s443_s11, 32  ;;  %p556_p1 = scmp.lt.s32.totalorder %s443_s11, %s443_s11 }
   0x7   :  { %34 = vperm.xlu0 %516, %v28_v1   ;;  %v172_v15 = vld [vmem:[%s715_s3] sm:$0xff]  ;;  %v54_v22 = vsub.s32 0, %v53_v19  ;;  %v78_v23 = vsub.s32 1, %v53_v19  ;;  %p552_p0 = scmp.ne.s32.totalorder %s443_s11, %s551_s12  ;;  %p557_p2 = scmp.lt.s32.totalorder %s551_s12, %s551_s12 }
   0x8   :  { %476 = vmatprep.mubr.msk.f32.mxu0 %vm200_vm0, %v172_v15  ;;  %v27_v24 = vld [vmem:[%s712_s0] sm:$0x3] }
   0x9   :  { %v55_v27 = vrot.slane %v27_v24, %v54_v22  ;;  %v79_v28 = vrot.slane %v27_v24, %v78_v23  ;;  %p558_p3 = por %p557_p2, %p556_p1 }
   0xa   :  { %514 = vset.pattern.permute.xlu1 %v576_v4 }
   0xb   :  { %39 = vperm.xlu0 %516, %v29_v3   ;;  %49 = vperm.xlu1 %514, %v31_v5   ;;  %p559_p4 = pnand %p558_p3, %p552_p0 }
   0xf   :  { %44 = vperm.xlu0 %516, %v30_v0   ;;  %517 = vset.pattern.permute.xlu1 %v575_v2 }
  0x10   :  { %73 = vperm.xlu1 %517, %v31_v5  }
  0x13   :  { %99 = vperm.xlu0 %516, %v89_v6  }
  0x14   :  { %518 = vset.pattern.permute.xlu1 %v576_v4 }
  0x15   :  { %94 = vperm.xlu1 %518, %v88_v7  }
  0x17   :  { %182 = vperm.xlu0 %516, %v176_v8  }
  0x19   :  { %104 = vperm.xlu1 %518, %v90_v9  }
  0x1b   :  { %192 = vperm.xlu0 %516, %v178_v10  }
  0x1d   :  { %109 = vperm.xlu1 %518, %v91_v11  }
  0x1f   :  { %358 = vperm.xlu0 %516, %v355_v12  }
  0x21   :  { %187 = vperm.xlu1 %518, %v177_v13  }
  0x25   :  { %197 = vperm.xlu1 %518, %v179_v14  }
  0x81   :  { %v62_v17 = vpop.permute.xlu1 %61  ;;  %v70_v18 = vpop.permute.xlu0 %69 }
  0x82   :  { %v80_v34 = vmul.f32 %v79_v28, %v62_v17  ;;  %v82_v41 = vmul.f32 %v79_v28, %v70_v18 }
  0x85   :  { %v66_v20 = vpop.permute.xlu1 %65 }
  0x86   :  { %v35_v21 = vpop.permute.xlu0 %34  ;;  %v81_v31 = vmul.f32 %v79_v28, %v66_v20 }
  0x87   :  { %v56_v32 = vmul.f32 %v55_v27, %v35_v21 }
  0x89   :  { %v84_v39 = vadd.f32 %v80_v34, %v56_v32 }
  0x8a   :  { %v40_v25 = vpop.permute.xlu0 %39  ;;  %v50_v26 = vpop.permute.xlu1 %49 }
  0x8b   :  { %v57_v29 = vmul.f32 %v55_v27, %v40_v25  ;;  %v59_v49 = vmul.f32 %v55_v27, %v50_v26 }
  0x8d   :  { %v85_v35 = vadd.f32 %v81_v31, %v57_v29 }
  0x8e   :  { %v45_v30 = vpop.permute.xlu0 %44 }
  0x8f   :  { %v74_v33 = vpop.permute.xlu1 %73  ;;  %v58_v37 = vmul.f32 %v55_v27, %v45_v30 }
  0x90   :  { %v83_v44 = vmul.f32 %v79_v28, %v74_v33 }
  0x91   :  { %v86_v47 = vadd.f32 %v82_v41, %v58_v37  ;;  %v173_v37 = vld [vmem:[%s715_s3 + $0x8] sm:$0xff]  ;;  %v579_v41 = vmov 0.0  }
  0x92   :  { %v100_v36 = vpop.permute.xlu0 %99  ;;  %v87_v53 = vadd.f32 %v83_v44, %v59_v49  ;;  %490 = vmatprep.mubr.msk.f32.mxu1 %vm578_vm9, %v579_v41  ;;  %v354_v41 = vld [vmem:[%s717_s5] sm:$0x3] }
  0x93   :  { %v113_v38 = vadd.f32 %v100_v36, %v85_v35 }
  0x94   :  { %v95_v40 = vpop.permute.xlu1 %94 }
  0x95   :  { %v117_v42 = vmin.f32 %v113_v38, 20.0  ;;  %v112_v43 = vadd.f32 %v95_v40, %v84_v39  ;;  %vm121_vm4 = vcmp.gt.f32.partialorder %v113_v38, 20.0  ;;  %v175_v39 = vld [vmem:[%s715_s3 + $0x18] sm:$0xff]  ;;  %v577_v40 = vmov 0.0|0.0  }
  0x96   :  { %501 = vmatprep.subr.bf16.mxu1 %v577_v40 }
  0x97   :  { %v126_v45 = vmul.f32 1.442695, %v117_v42  ;;  %v116_v46 = vmin.f32 %v112_v43, 20.0  ;;  %vm120_vm3 = vcmp.gt.f32.partialorder %v112_v43, 20.0 }
  0x98   :  { %v105_v48 = vpop.permute.xlu1 %104 }
  0x99   :  { %519 = vpow2.f32 %v126_v45  ;;  %v124_v50 = vmul.f32 1.442695, %v116_v46  ;;  %v667_v51 = vadd.f32 %v105_v48, %v86_v47 }
  0x9b   :  { %521 = vpow2.f32 %v124_v50  ;;  %v118_v52 = vmin.f32 %v667_v51, 20.0  ;;  %vm122_vm7 = vcmp.gt.f32.partialorder %v667_v51, 20.0 }
  0x9c   :  { %v110_v54 = vpop.permute.xlu1 %109 }
  0x9d   :  { %v128_v55 = vmul.f32 1.442695, %v118_v52  ;;  %v115_v56 = vadd.f32 %v110_v54, %v87_v53 }
  0x9f   :  { %523 = vpow2.f32 %v128_v55  ;;  %v119_v57 = vmin.f32 %v115_v56, 20.0  ;;  %vm123_vm8 = vcmp.gt.f32.partialorder %v115_v56, 20.0 }
  0xa0   :  { %v188_v42 = vpop.permute.xlu1 %187 }
  0xa1   :  { %v130_v58 = vmul.f32 1.442695, %v119_v57 }
  0xa3   :  { %v520_v59 = vpop.eup %519  ;;  %525 = vpow2.f32 %v130_v58 }
  0xa4   :  { %v141_v60 = vadd.f32 1.0, %v520_v59  ;;  %v144_v0 = vmul.f32 -0.5, %v520_v59  ;;  %v147_v5 = vand.u32 2147483647, %v520_v59  ;;  %v198_v49 = vpop.permute.xlu1 %197 }
  0xa5   :  { %v522_v61 = vpop.eup %521 }
  0xa6   :  { %v132_v62 = vadd.f32 1.0, %v522_v61  ;;  %527 = vlog2.f32 %v141_v60  ;;  %v135_v2 = vmul.f32 -0.5, %v522_v61  ;;  %v145_v4 = vadd.f32 1.0, %v144_v0 }
  0xa7   :  { %v138_v9 = vand.u32 2147483647, %v522_v61  ;;  %vm148_vm1 = vcmp.lt.f32.partialorder %v147_v5, 0.0004427343 }
  0xa8   :  { %529 = vlog2.f32 %v132_v62  ;;  %v136_v7 = vadd.f32 1.0, %v135_v2  ;;  %v146_v11 = vmul.f32 %v520_v59, %v145_v4 }
  0xa9   :  { %v524_v63 = vpop.eup %523  ;;  %vm139_vm2 = vcmp.lt.f32.partialorder %v138_v9, 0.0004427343 }
  0xaa   :  { %v150_v1 = vadd.f32 1.0, %v524_v63  ;;  %v153_v12 = vmul.f32 -0.5, %v524_v63  ;;  %v137_v15 = vmul.f32 %v522_v61, %v136_v7  ;;  %v156_v23 = vand.u32 2147483647, %v524_v63 }
  0xac   :  { %531 = vlog2.f32 %v150_v1  ;;  %v154_v19 = vadd.f32 1.0, %v153_v12  ;;  %vm157_vm5 = vcmp.lt.f32.partialorder %v156_v23, 0.0004427343 }
  0xad   :  { %v526_v3 = vpop.eup %525 }
  0xae   :  { %v159_v6 = vadd.f32 1.0, %v526_v3  ;;  %v162_v17 = vmul.f32 -0.5, %v526_v3  ;;  %v165_v27 = vand.u32 2147483647, %v526_v3  ;;  %v155_v28 = vmul.f32 %v524_v63, %v154_v19 }
  0xb0   :  { %v528_v8 = vpop.eup %527  ;;  %533 = vlog2.f32 %v159_v6  ;;  %v163_v26 = vadd.f32 1.0, %v162_v17  ;;  %vm166_vm6 = vcmp.lt.f32.partialorder %v165_v27, 0.0004427343 }
  0xb1   :  { %v143_v10 = vmul.f32 0.6931472, %v528_v8 }
  0xb2   :  { %v530_v13 = vpop.eup %529  ;;  %v164_v32 = vmul.f32 %v526_v3, %v163_v26 }
  0xb3   :  { %v134_v14 = vmul.f32 0.6931472, %v530_v13  ;;  %v149_v16 = vsel %vm148_vm1, %v146_v11, %v143_v10 }
  0xb4   :  { %v169_v22 = vsel %vm121_vm4, %v113_v38, %v149_v16  ;;  %v174_v38 = vld [vmem:[%s715_s3 + $0x10] sm:$0xff] }
  0xb5   :  { %v140_v18 = vsel %vm139_vm2, %v137_v15, %v134_v14 }
  0xb6   :  { %v532_v20 = vpop.eup %531  ;;  %v168_v21 = vsel %vm120_vm3, %v112_v43, %v140_v18  ;;  %v183_v43 = vpop.permute.xlu0 %182  ;;  %vm434_vm3 = vcmask 58368  }
  0xb7   :  { %v493_v24 = vpack.c.bf16 %v169_v22, %v168_v21  ;;  %v152_v25 = vmul.f32 0.6931472, %v532_v20 }
  0xb9   :  { %494 = vmatprep.subr.bf16.mxu0 %v493_v24  ;;  %v158_v30 = vsel %vm157_vm5, %v155_v28, %v152_v25 }
  0xba   :  { %v534_v29 = vpop.eup %533  ;;  %496 = vmatpush3.bf16.msra.mxu0 %v493_v24  ;;  %v170_v34 = vsel %vm122_vm7, %v667_v51, %v158_v30  ;;  %v193_v52 = vpop.permute.xlu0 %192 }
  0xbb   :  { %v161_v31 = vmul.f32 0.6931472, %v534_v29 }
  0xbd   :  { %v167_v33 = vsel %vm166_vm6, %v164_v32, %v161_v31 }
  0xbe   :  { %v171_v35 = vsel %vm123_vm8, %v115_v56, %v167_v33 }
  0xbf   :  { %v497_v36 = vpack.c.bf16 %v171_v35, %v170_v34 }
  0xc1   :  { %498 = vmatprep.subr.bf16.mxu0 %v497_v36 }
  0xc2   :  { %500 = vmatpush3.bf16.msra.mxu0 %v497_v36 }
  0xc5   :  { %477 = vmatmul.mubr.msk.f32.vlgmr.msra.gmra.mrb[0].mxu0 %vm200_vm0, %v173_v37 }
  0xc6   :  { %479 = vmatprep.mubr.msk.f32.mxu0 %vm200_vm0, %v174_v38 }
  0xc9   :  { %480 = vmatmul.mubr.msk.f32.gmra.mrb[2].mxu0 %vm200_vm0, %v175_v39 }
 0x198   :  { %v478_v44 = vpop.f32.mrb[0].mxu0 }
 0x199   :  { %v285_v45 = vadd.f32 %v478_v44, %v188_v42  ;;  %v279_v46 = vpop.f32.mrb[1].mxu0  ;;  %v359_v42 = vpop.permute.xlu0 %358 }
 0x19a   :  { %v280_v47 = vadd.f32 %v279_v46, %v183_v43 }
 0x19b   :  { %v299_v48 = vmin.f32 %v285_v45, 20.0  ;;  %vm303_vm11 = vcmp.gt.f32.partialorder %v285_v45, 20.0 }
 0x19c   :  { %v298_v50 = vmin.f32 %v280_v47, 20.0  ;;  %v481_v51 = vpop.f32.mrb[2].mxu0  ;;  %vm302_vm13 = vcmp.gt.f32.partialorder %v280_v47, 20.0 }
 0x19d   :  { %v308_v53 = vmul.f32 1.442695, %v299_v48  ;;  %v685_v54 = vadd.f32 %v481_v51, %v198_v49  ;;  %v289_v55 = vpop.f32.mrb[3].mxu0 }
 0x19e   :  { %v306_v56 = vmul.f32 1.442695, %v298_v50  ;;  %v687_v57 = vadd.f32 %v289_v55, %v193_v52 }
 0x19f   :  { %535 = vpow2.f32 %v308_v53  ;;  %v301_v58 = vmin.f32 %v685_v54, 20.0  ;;  %vm305_vm15 = vcmp.gt.f32.partialorder %v685_v54, 20.0 }
 0x1a0   :  { %537 = vpow2.f32 %v306_v56  ;;  %v300_v59 = vmin.f32 %v687_v57, 20.0  ;;  %vm304_vm2 = vcmp.gt.f32.partialorder %v687_v57, 20.0 }
 0x1a1   :  { %v312_v60 = vmul.f32 1.442695, %v301_v58 }
 0x1a2   :  { %v310_v61 = vmul.f32 1.442695, %v300_v59 }
 0x1a3   :  { %539 = vpow2.f32 %v312_v60 }
 0x1a4   :  { %541 = vpow2.f32 %v310_v61 }
 0x1a9   :  { %v536_v62 = vpop.eup %535 }
 0x1aa   :  { %v538_v63 = vpop.eup %537  ;;  %v323_v0 = vadd.f32 1.0, %v536_v62  ;;  %v326_v5 = vmul.f32 -0.5, %v536_v62  ;;  %v329_v9 = vand.u32 2147483647, %v536_v62 }
 0x1ab   :  { %v314_v1 = vadd.f32 1.0, %v538_v63  ;;  %v317_v7 = vmul.f32 -0.5, %v538_v63  ;;  %v320_v13 = vand.u32 2147483647, %v538_v63 }
 0x1ac   :  { %543 = vlog2.f32 %v323_v0  ;;  %v327_v8 = vadd.f32 1.0, %v326_v5  ;;  %vm330_vm10 = vcmp.lt.f32.partialorder %v329_v9, 0.0004427343 }
 0x1ad   :  { %v540_v2 = vpop.eup %539  ;;  %545 = vlog2.f32 %v314_v1  ;;  %v318_v11 = vadd.f32 1.0, %v317_v7  ;;  %vm321_vm12 = vcmp.lt.f32.partialorder %v320_v13, 0.0004427343 }
 0x1ae   :  { %v542_v3 = vpop.eup %541  ;;  %v341_v4 = vadd.f32 1.0, %v540_v2  ;;  %v344_v10 = vmul.f32 -0.5, %v540_v2  ;;  %v328_v17 = vmul.f32 %v536_v62, %v327_v8  ;;  %v347_v22 = vand.u32 2147483647, %v540_v2 }
 0x1af   :  { %v332_v6 = vadd.f32 1.0, %v542_v3  ;;  %v335_v12 = vmul.f32 -0.5, %v542_v3  ;;  %v319_v20 = vmul.f32 %v538_v63, %v318_v11  ;;  %v338_v24 = vand.u32 2147483647, %v542_v3 }
 0x1b0   :  { %547 = vlog2.f32 %v341_v4  ;;  %v345_v18 = vadd.f32 1.0, %v344_v10  ;;  %vm348_vm14 = vcmp.lt.f32.partialorder %v347_v22, 0.0004427343 }
 0x1b1   :  { %549 = vlog2.f32 %v332_v6  ;;  %v336_v21 = vadd.f32 1.0, %v335_v12  ;;  %vm339_vm1 = vcmp.lt.f32.partialorder %v338_v24, 0.0004427343 }
 0x1b2   :  { %v346_v31 = vmul.f32 %v540_v2, %v345_v18 }
 0x1b3   :  { %v337_v34 = vmul.f32 %v542_v3, %v336_v21 }
 0x1b6   :  { %v544_v14 = vpop.eup %543 }
 0x1b7   :  { %v546_v15 = vpop.eup %545  ;;  %v325_v16 = vmul.f32 0.6931472, %v544_v14 }
 0x1b8   :  { %v316_v19 = vmul.f32 0.6931472, %v546_v15 }
 0x1b9   :  { %v331_v23 = vsel %vm330_vm10, %v328_v17, %v325_v16 }
 0x1ba   :  { %v548_v25 = vpop.eup %547  ;;  %v322_v26 = vsel %vm321_vm12, %v319_v20, %v316_v19  ;;  %v351_v27 = vsel %vm303_vm11, %v285_v45, %v331_v23 }
 0x1bb   :  { %v550_v28 = vpop.eup %549  ;;  %v350_v29 = vsel %vm302_vm13, %v280_v47, %v322_v26  ;;  %v343_v30 = vmul.f32 0.6931472, %v548_v25 }
 0x1bc   :  { %v502_v32 = vpack.c.bf16 %v351_v27, %v350_v29  ;;  %v334_v33 = vmul.f32 0.6931472, %v550_v28 }
 0x1bd   :  { %v349_v35 = vsel %vm348_vm14, %v346_v31, %v343_v30 }
 0x1be   :  { %503 = vmatpush3.bf16.msra.mxu1 %v502_v32  ;;  %v340_v36 = vsel %vm339_vm1, %v337_v34, %v334_v33  ;;  %v353_v37 = vsel %vm305_vm15, %v685_v54, %v349_v35 }
 0x1bf   :  { %504 = vmatprep.subr.bf16.mxu1 %v577_v40  ;;  %v352_v38 = vsel %vm304_vm2, %v687_v57, %v340_v36 }
 0x1c0   :  { %v505_v39 = vpack.c.bf16 %v353_v37, %v352_v38 }
 0x1c2   :  { %506 = vmatpush3.bf16.msra.mxu1 %v505_v39 }
 0x1c5   :  { %491 = vmatmul.mubr.msk.f32.vlgmr.msra.gmra.mrb[0].mxu1 %vm200_vm0, %v354_v41 }
 0x298   :  { %v430_v43 = vpop.f32.mrb[0].mxu1 }
 0x299   :  { %v431_v44 = vadd.f32 %v430_v43, %v359_v42  ;;  %v492_v45 = vpop.f32.mrb[1].mxu1 }
 0x29b   :  { %435 = vst.msk [vmem:[#allocation2] sm:$0x3] %vm434_vm3, %v431_v44 }
 0x29c   :  { %562 = shalt.err (!%p559_p4)
}
 0x29d   :  { %s563_s14 = scalar_lea.hbm %s719_s7, 32 }
 0x29e   :  { %p564_p5 = scmp.ne.s32.totalorder %s719_s7, %s563_s14  ;;  %p567_p6 = scmp.lt.u32.totalorder %s563_s14, %s719_s7 }
 0x2a0   :  { %p569_p7 = pnand %p567_p6, %p564_p5 }
 0x2a2   :  { %572 = shalt.err (!%p569_p7)
}
 0x2a3   :  { %445 = dma.vmem_to_hbm [thread:$0]  %s443_s11, 32, %s719_s7, [#allocation3]  }
 0x2a4   :  { %573 = dma.done.wait [#allocation3], 32  }
 0x2a5   :  { %574 = vsyncadd [#allocation3], 4294967264 }
 0x2a6   :  { %449 = vsyncpa [#allocation3], 1 }

</bundles_post_ra>
